<compile_context>
chip_gen: v7x
topology: tpu7x:2x2x1
jax: 0.10.0
libtpu: 0.0.40
codegen_flags: <defaults>
</compile_context>

<pallas_src>
import jax
import jax.numpy as jnp
from jax import lax
from jax.experimental import pallas as pl
from jax.experimental.pallas import tpu as pltpu


def _round_up(x, m):
    return (x + m - 1) // m * m


def _log_sigmoid(x):
    # Stable log(sigmoid(x)) = min(x, 0) - log(1 + exp(-|x|)).
    # Transcendentals only touch [TB, 1] score columns (EUP slot, never binding).
    return jnp.minimum(x, 0.0) - jnp.log(1.0 + jnp.exp(-jnp.abs(x)))


def pad_embedding_tables(u_emb, w_emb, *, table_dtype=jnp.float32):
    """Pad (and optionally downcast) both embedding tables to lane-dense
    [Vp, Dp] tiles.  Call ONCE per parameter update and reuse across steps —
    this hoists the pad + full-table HBM copy out of the per-call path."""
    vocab, dim = u_emb.shape
    vp = _round_up(vocab, 128)
    dp = _round_up(dim, 128)

    def pad(t):
        return jnp.zeros((vp, dp), table_dtype).at[:vocab, :dim].set(
            t.astype(table_dtype))

    return pad(u_emb), pad(w_emb)


def _make_kernel(inv_c, ctx_len, vp):
    """Build the Pallas kernel with the context scale / layout baked in."""

    def kernel(idx_ref, u_tab_ref, w_tab_ref, out_ref):
        idx = idx_ref[...]                               # [TB, C+2] int32 packed rows
        tb = idx.shape[0]

        ctx_idx = idx[:, :ctx_len]                       # [TB, C] context word ids
        tgt_idx = idx[:, ctx_len:ctx_len + 1]            # [TB, 1] target (tree) id
        sign = idx[:, ctx_len + 1:ctx_len + 2].astype(jnp.float32)  # -1/+1 (0 = pad)

        # One iota, shared by the context-count build and the target one-hot.
        lane_ids = lax.broadcasted_iota(jnp.int32, (tb, vp), 1)

        counts = jnp.zeros((tb, vp), jnp.float32)
        for j in range(ctx_len):                         # static unroll; C is small
            counts = counts + (lane_ids == ctx_idx[:, j:j + 1]).astype(jnp.float32)
        onehot = (lane_ids == tgt_idx).astype(jnp.float32)

        u_tab = u_tab_ref[...]                           # [Vp, Dp] VMEM-resident
        w_tab = w_tab_ref[...]                           # [Vp, Dp] VMEM-resident

        # Two MXU gathers per block (fused pos+neg rows), exact multi-hot counts.
        ctx_emb = jnp.dot(counts.astype(u_tab.dtype), u_tab,
                          preferred_element_type=jnp.float32)   # [TB, Dp]
        tgt_emb = jnp.dot(onehot.astype(w_tab.dtype), w_tab,
                          preferred_element_type=jnp.float32)   # [TB, Dp]

        # Deferred 1/C: scale the [TB, 1] scores, not the [TB, Dp] tiles.
        score = jnp.sum(ctx_emb * tgt_emb, axis=1, keepdims=True) * inv_c

        # sign = -1 for pos rows (logsigmoid(-s)), +1 for neg rows (logsigmoid(s)),
        # 0 for padded rows (|sign| masks their contribution to exactly 0).
        contrib = _log_sigmoid(sign * score) * jnp.abs(sign)
        # PyTorch-parity scaling: divide by the constant 128, not the batch size.
        partial = -jnp.sum(contrib) * (1.0 / 128.0)

        # Broadcast into this block's (8,128)-aligned partial-loss slot; the
        # wrapper reads element [i, 0, 0] of each block and sums.
        out_ref[...] = jnp.full(out_ref.shape, partial, jnp.float32)

    return kernel


def cbow_hs_loss(u_tab, w_tab, pos_u_idx, pos_w_idx, neg_u_idx, neg_w_idx,
                 *, block_b=None):
    """Forward pass of CBOWModel (hierarchical-softmax CBOW loss).

    u_tab, w_tab          : embedding tables; ideally pre-padded once via
                            pad_embedding_tables() (raw [2*emb_size-1, D]
                            tables are padded on the fly as a fallback).
    pos_u_idx, neg_u_idx  : [Bp, C] / [Bn, C] int context word ids (fixed C)
    pos_w_idx, neg_w_idx  : [Bp]    / [Bn]    int target (tree node) ids
    """
    vocab, dim = u_tab.shape
    if vocab % 128 or dim % 128:
        # Fallback: pad here (prefer hoisting via pad_embedding_tables()).
        u_tab, w_tab = pad_embedding_tables(u_tab, w_tab, table_dtype=u_tab.dtype)
    vp, dp = u_tab.shape

    bp, ctx = pos_u_idx.shape
    bn, ctx_n = neg_u_idx.shape
    assert ctx == ctx_n, "pos/neg contexts must share one fixed length C"

    # Pack each (context, target) pair as one int32 row: [C ctx ids | target | sign].
    def pack(u, w, sgn):
        b = u.shape[0]
        return jnp.concatenate(
            [u.astype(jnp.int32),
             w.astype(jnp.int32).reshape(b, 1),
             jnp.full((b, 1), sgn, jnp.int32)], axis=1)

    rows = jnp.concatenate([pack(pos_u_idx, pos_w_idx, -1),
                            pack(neg_u_idx, neg_w_idx, +1)], axis=0)
    n_rows = bp + bn

    if block_b is None:
        # Up to 256 rows per block (good MXU fill), but keep >= 2 blocks when
        # the batch allows so v7x's two TensorCores both get work; harmless on
        # single-TC v5e/v6e since the step count stays tiny.
        block_b = max(8, min(256, _round_up(-(-n_rows // 2), 8)))
    assert block_b % 8 == 0, "block_b must be a multiple of 8 (sublane tiling)"

    nb = -(-n_rows // block_b)
    n_pad = nb * block_b
    if n_pad != n_rows:
        # Remainder handling: sign=0 pad rows contribute exactly zero loss.
        rows = jnp.concatenate(
            [rows, jnp.zeros((n_pad - n_rows, ctx + 2), jnp.int32)], axis=0)

    kernel = _make_kernel(inv_c=1.0 / ctx, ctx_len=ctx, vp=vp)

    partials = pl.pallas_call(
        kernel,
        out_shape=jax.ShapeDtypeStruct((nb, 8, 128), jnp.float32),
        grid=(nb,),
        in_specs=[
            pl.BlockSpec((block_b, ctx + 2), lambda i: (i, 0)),  # packed index rows
            pl.BlockSpec((vp, dp), lambda i: (0, 0)),            # u table (resident)
            pl.BlockSpec((vp, dp), lambda i: (0, 0)),            # w table (resident)
        ],
        out_specs=pl.BlockSpec((1, 8, 128), lambda i: (i, 0, 0)),
        compiler_params=pltpu.CompilerParams(
            dimension_semantics=("parallel",),   # row blocks are independent
            vmem_limit_bytes=32 * 1024 * 1024,   # fits v5e/v6e/v7x scoped limits
        ),
    )(rows, u_tab, w_tab)

    return jnp.sum(partials[:, 0, 0])


def _reference_loss(u_emb, w_emb, pos_u_idx, pos_w_idx, neg_u_idx, neg_w_idx):
    pos_ctx = jnp.mean(u_emb[pos_u_idx], axis=1)
    neg_ctx = jnp.mean(u_emb[neg_u_idx], axis=1)
    s = jnp.sum(pos_ctx * w_emb[pos_w_idx], axis=1)
    ns = jnp.sum(neg_ctx * w_emb[neg_w_idx], axis=1)
    loss = jnp.sum(jax.nn.log_sigmoid(-s)) + jnp.sum(jax.nn.log_sigmoid(ns))
    return -loss / 128.0


if __name__ == "__main__":
    emb_size = 16          # HS tree -> vocab = 2*emb_size - 1 = 31 nodes
    emb_dimension = 32     # D
    vocab = 2 * emb_size - 1
    batch = 16             # batch of (context, target) pairs
    ctx = 4                # fixed context-window length

    key = jax.random.PRNGKey(0)
    k_u, k_w, k1, k2, k3, k4 = jax.random.split(key, 6)

    int_range = 0.5 / emb_dimension
    u_embeddings = jax.random.uniform(
        k_u, (vocab, emb_dimension), jnp.float32, -int_range, int_range)
    w_embeddings = jax.random.uniform(
        k_w, (vocab, emb_dimension), jnp.float32, -int_range, int_range)

    pos_u = jax.random.randint(k1, (batch, ctx), 0, vocab, dtype=jnp.int32)
    pos_w = jax.random.randint(k2, (batch,), 0, vocab, dtype=jnp.int32)
    neg_u = jax.random.randint(k3, (batch, ctx), 0, vocab, dtype=jnp.int32)
    neg_w = jax.random.randint(k4, (batch,), 0, vocab, dtype=jnp.int32)

    # Pad the tables ONCE (hoisted out of the per-step path), then jit the loss.
    u_pad, w_pad = pad_embedding_tables(u_embeddings, w_embeddings)
    loss_fn = jax.jit(cbow_hs_loss)

    loss = loss_fn(u_pad, w_pad, pos_u, pos_w, neg_u, neg_w)
    loss = jax.block_until_ready(loss)

    ref = _reference_loss(u_embeddings, w_embeddings, pos_u, pos_w, neg_u, neg_w)
    assert jnp.allclose(loss, ref, atol=1e-5, rtol=1e-5), (loss, ref)

    print("KERNEL_OK")
</pallas_src>

<mosaic_0001>
module attributes {stable_mosaic.version = 11 : i64} {
  func.func @kernel(%arg0: i32, %arg1: memref<16x6xi32, #tpu.memory_space<vmem>>, %arg2: memref<128x128xf32, #tpu.memory_space<vmem>>, %arg3: memref<128x128xf32, #tpu.memory_space<vmem>>, %arg4: memref<1x8x128xf32, #tpu.memory_space<vmem>>) attributes {dimension_semantics = [#tpu.dimension_semantics<parallel>], iteration_bounds = array<i64: 2>, scalar_prefetch = 0 : i64, scratch_operands = 0 : i64, tpu.core_type = #tpu.core_type<tc>, window_params = [{transform_indices = @transform_0, window_bounds = array<i64: 16, 6>}, {pipeline_mode = #tpu.pipeline_mode<synchronous>, transform_indices = @transform_1, window_bounds = array<i64: 128, 128>}, {pipeline_mode = #tpu.pipeline_mode<synchronous>, transform_indices = @transform_2, window_bounds = array<i64: 128, 128>}, {transform_indices = @transform_3, window_bounds = array<i64: 1, 8, 128>}]} {
    %c0 = arith.constant 0 : index
    %c0_0 = arith.constant 0 : index
    %0 = vector.load %arg1[%c0, %c0_0] : memref<16x6xi32, #tpu.memory_space<vmem>>, vector<16x6xi32>
    %1 = vector.extract_strided_slice %0 {offsets = [0, 0], sizes = [16, 4], strides = [1, 1]} : vector<16x6xi32> to vector<16x4xi32>
    %2 = vector.extract_strided_slice %0 {offsets = [0, 4], sizes = [16, 1], strides = [1, 1]} : vector<16x6xi32> to vector<16x1xi32>
    %3 = vector.extract_strided_slice %0 {offsets = [0, 5], sizes = [16, 1], strides = [1, 1]} : vector<16x6xi32> to vector<16x1xi32>
    %4 = arith.sitofp %3 : vector<16x1xi32> to vector<16x1xf32>
    %5 = tpu.iota {dimensions = array<i32: 1>} : vector<16x128xi32>
    %cst = arith.constant 0.000000e+00 : f32
    %6 = vector.broadcast %cst : f32 to vector<16x128xf32>
    %7 = vector.extract_strided_slice %1 {offsets = [0, 0], sizes = [16, 1], strides = [1, 1]} : vector<16x4xi32> to vector<16x1xi32>
    %8 = vector.broadcast %7 : vector<16x1xi32> to vector<16x128xi32>
    %9 = arith.cmpi eq, %5, %8 : vector<16x128xi32>
    %10 = arith.extui %9 : vector<16x128xi1> to vector<16x128xi32>
    %11 = arith.sitofp %10 : vector<16x128xi32> to vector<16x128xf32>
    %12 = arith.addf %6, %11 : vector<16x128xf32>
    %13 = vector.extract_strided_slice %1 {offsets = [0, 1], sizes = [16, 1], strides = [1, 1]} : vector<16x4xi32> to vector<16x1xi32>
    %14 = vector.broadcast %13 : vector<16x1xi32> to vector<16x128xi32>
    %15 = arith.cmpi eq, %5, %14 : vector<16x128xi32>
    %16 = arith.extui %15 : vector<16x128xi1> to vector<16x128xi32>
    %17 = arith.sitofp %16 : vector<16x128xi32> to vector<16x128xf32>
    %18 = arith.addf %12, %17 : vector<16x128xf32>
    %19 = vector.extract_strided_slice %1 {offsets = [0, 2], sizes = [16, 1], strides = [1, 1]} : vector<16x4xi32> to vector<16x1xi32>
    %20 = vector.broadcast %19 : vector<16x1xi32> to vector<16x128xi32>
    %21 = arith.cmpi eq, %5, %20 : vector<16x128xi32>
    %22 = arith.extui %21 : vector<16x128xi1> to vector<16x128xi32>
    %23 = arith.sitofp %22 : vector<16x128xi32> to vector<16x128xf32>
    %24 = arith.addf %18, %23 : vector<16x128xf32>
    %25 = vector.extract_strided_slice %1 {offsets = [0, 3], sizes = [16, 1], strides = [1, 1]} : vector<16x4xi32> to vector<16x1xi32>
    %26 = vector.broadcast %25 : vector<16x1xi32> to vector<16x128xi32>
    %27 = arith.cmpi eq, %5, %26 : vector<16x128xi32>
    %28 = arith.extui %27 : vector<16x128xi1> to vector<16x128xi32>
    %29 = arith.sitofp %28 : vector<16x128xi32> to vector<16x128xf32>
    %30 = arith.addf %24, %29 : vector<16x128xf32>
    %31 = vector.broadcast %2 : vector<16x1xi32> to vector<16x128xi32>
    %32 = arith.cmpi eq, %5, %31 : vector<16x128xi32>
    %33 = arith.extui %32 : vector<16x128xi1> to vector<16x128xi32>
    %34 = arith.sitofp %33 : vector<16x128xi32> to vector<16x128xf32>
    %c0_1 = arith.constant 0 : index
    %c0_2 = arith.constant 0 : index
    %35 = vector.load %arg2[%c0_1, %c0_2] : memref<128x128xf32, #tpu.memory_space<vmem>>, vector<128x128xf32>
    %c0_3 = arith.constant 0 : index
    %c0_4 = arith.constant 0 : index
    %36 = vector.load %arg3[%c0_3, %c0_4] : memref<128x128xf32, #tpu.memory_space<vmem>>, vector<128x128xf32>
    %cst_5 = arith.constant dense<0.000000e+00> : vector<16x128xf32>
    %37 = tpu.matmul %30, %35, %cst_5 {dimension_numbers = #tpu.dot_dimension_numbers<[1], [0], [0], [1], [0, 0, 1, 1], [], []>} : vector<16x128xf32>, vector<128x128xf32>, vector<16x128xf32> -> vector<16x128xf32>
    %cst_6 = arith.constant dense<0.000000e+00> : vector<16x128xf32>
    %38 = tpu.matmul %34, %36, %cst_6 {dimension_numbers = #tpu.dot_dimension_numbers<[1], [0], [0], [1], [0, 0, 1, 1], [], []>} : vector<16x128xf32>, vector<128x128xf32>, vector<16x128xf32> -> vector<16x128xf32>
    %39 = arith.mulf %37, %38 : vector<16x128xf32>
    %cst_7 = arith.constant dense<0.000000e+00> : vector<16xf32>
    %40 = vector.multi_reduction <add>, %39, %cst_7 [1] : vector<16x128xf32> to vector<16xf32>
    %41 = vector.shape_cast %40 : vector<16xf32> to vector<16x1xf32>
    %cst_8 = arith.constant 2.500000e-01 : f32
    %42 = vector.broadcast %cst_8 : f32 to vector<16x1xf32>
    %43 = arith.mulf %41, %42 : vector<16x1xf32>
    %44 = arith.mulf %4, %43 : vector<16x1xf32>
    %cst_9 = arith.constant 0.000000e+00 : f32
    %45 = vector.broadcast %cst_9 : f32 to vector<16x1xf32>
    %46 = arith.minimumf %44, %45 : vector<16x1xf32>
    %47 = math.absf %44 : vector<16x1xf32>
    %cst_10 = arith.constant 0.000000e+00 : f32
    %48 = vector.broadcast %cst_10 : f32 to vector<16x1xf32>
    %49 = arith.subf %48, %47 : vector<16x1xf32>
    %50 = math.exp %49 : vector<16x1xf32>
    %cst_11 = arith.constant 1.000000e+00 : f32
    %51 = vector.broadcast %cst_11 : f32 to vector<16x1xf32>
    %52 = arith.addf %51, %50 : vector<16x1xf32>
    %53 = math.log %52 : vector<16x1xf32>
    %54 = arith.subf %46, %53 : vector<16x1xf32>
    %55 = math.absf %4 : vector<16x1xf32>
    %56 = arith.mulf %54, %55 : vector<16x1xf32>
    %57 = vector.shape_cast %56 : vector<16x1xf32> to vector<1x16x1xf32>
    %cst_12 = arith.constant dense<0.000000e+00> : vector<1xf32>
    %58 = vector.multi_reduction <add>, %57, %cst_12 [1, 2] : vector<1x16x1xf32> to vector<1xf32>
    %59 = vector.shape_cast %58 : vector<1xf32> to vector<1x1x1xf32>
    %60 = vector.extract %59[0, 0, 0] : f32 from vector<1x1x1xf32>
    %cst_13 = arith.constant 0.000000e+00 : f32
    %61 = arith.subf %cst_13, %60 : f32
    %cst_14 = arith.constant 7.812500e-03 : f32
    %62 = arith.mulf %61, %cst_14 : f32
    %63 = vector.broadcast %62 : f32 to vector<1x8x128xf32>
    %c0_15 = arith.constant 0 : index
    %c0_16 = arith.constant 0 : index
    %c0_17 = arith.constant 0 : index
    %64 = vector.load %arg4[%c0_15, %c0_16, %c0_17] : memref<1x8x128xf32, #tpu.memory_space<vmem>>, vector<1x8x128xf32>
    tpu.vector_store %arg4[%c0_15, %c0_16, %c0_17], %63 {strides = array<i32>} : memref<1x8x128xf32, #tpu.memory_space<vmem>>, vector<1x8x128xf32>,
    return
  }
  func.func @transform_0(%arg0: i32) -> (i32, i32) {
    %c0_i32 = arith.constant 0 : i32
    %c0_i32_0 = arith.constant 0 : i32
    return %arg0, %c0_i32 : i32, i32
  }
  func.func @transform_1(%arg0: i32) -> (i32, i32) {
    %c0_i32 = arith.constant 0 : i32
    %c0_i32_0 = arith.constant 0 : i32
    %c0_i32_1 = arith.constant 0 : i32
    return %c0_i32, %c0_i32_0 : i32, i32
  }
  func.func @transform_2(%arg0: i32) -> (i32, i32) {
    %c0_i32 = arith.constant 0 : i32
    %c0_i32_0 = arith.constant 0 : i32
    %c0_i32_1 = arith.constant 0 : i32
    return %c0_i32, %c0_i32_0 : i32, i32
  }
  func.func @transform_3(%arg0: i32) -> (i32, i32, i32) {
    %c0_i32 = arith.constant 0 : i32
    %c0_i32_0 = arith.constant 0 : i32
    %c0_i32_1 = arith.constant 0 : i32
    return %arg0, %c0_i32, %c0_i32_0 : i32, i32, i32
  }
}

</mosaic_0001>

<bundles_post_ra>
// kernel: cbow_hs_loss.1
= control target key start
LH: loop header
LB: loop body
LE: loop exit
PB: predicated region body
PF: predicated region fallthrough
CT: control target
= control target key end

     0   :  { %8 = vsyncpa [#allocation3], 0  ;;  %s1057_s0 = inlined_call_operand.vmem [shape: s32[32,6], index: 0, kind: input, shape index: {}]   ;;  %s1058_s1 = inlined_call_operand.hbm [shape: f32[128,128], index: 1, kind: input, shape index: {}]   ;;  %s1059_s2 = inlined_call_operand.hbm [shape: f32[128,128], index: 2, kind: input, shape index: {}]   ;;  %s1060_s3 = inlined_call_operand.vmem [shape: f32[2,8,128], index: 3, kind: output, shape index: {}]  }
   0x1   :  { %9 = vsyncpa [#allocation5], 0  ;;  %s947_s12 = smov 0  }
   0x2 LB: > { %s953_s13 = sadd.s32 4294967295, %s913_s12   ;;  %p591_p0 = scmp.ge.s32.totalorder %s913_s12, 1  ;;  %s913_s12 = sphi %s947_s12, %s15_s12  }
   0x3   : > { %p114_p1 = scmp.lt.s32.totalorder %s913_s12, 3  ;;  %s915_s14 = smov [#allocation2]  }
   0x4   : > { %s126_s15 = sshll.u32 %s915_s14, 4  ;;  %p1061_p3 = scmp.eq.s32.totalorder %s953_s13, 0  ;;  %s127_s15 = int_to_ptr.vmem [resolvable:$true] %s126_s15 }
   0x5   : > { %p957_p2 = pnand %p591_p0, %p114_p1  ;;  %s916_s17 = smov [#allocation4]  }
   0x6   : > { %s139_s18 = sshll.u32 %s916_s17, 4  ;;  %s843_s22 = scalar_lea.hbm %s1058_s1, 2048  ;;  %s970_s18 = int_to_ptr.vmem [resolvable:$true] %s139_s18 }
   0x7   : > { %s1063_s16 = scalar_select %p957_p2, 1, 0 }
   0x8   : > { %p795_p4 = pneg %p957_p2  ;;  %p844_p6 = scmp.ne.s32.totalorder %s1058_s1, %s843_s22 }
   0x9   : > { %p850_p10 = scmp.lt.u32.totalorder %s843_s22, %s1058_s1 }
   0xa   : > { %p966_p5 = pnand %p1061_p3, %p795_p4 }
   0xc   : > { %p845_p7 = pneg %p966_p5 }
   0xe   : > { %p846_p8 = pnand %p845_p7, %p844_p6 }
  0x10   : > { %p847_p9 = pneg %p846_p8 }
  0x12   : > { %p852_p11 = pnand %p850_p10, %p847_p9 }
  0x14   : > { %855 = shalt.err (!%p852_p11)
}
  0x15   : > { %s856_s27 = scalar_lea.vmem %s127_s15, 2048  ;;  %p864_p1 = scmp.lt.s32.totalorder %s127_s15, %s127_s15 }
  0x16   : > { %p857_p12 = scmp.ne.s32.totalorder %s127_s15, %s856_s27  ;;  %p865_p4 = scmp.lt.s32.totalorder %s856_s27, %s856_s27 }
  0x18   : > { %p859_p13 = pnand %p857_p12, %p845_p7  ;;  %p866_p3 = por %p865_p4, %p864_p1 }
  0x1a   : > { %p860_p0 = pneg %p859_p13 }
  0x1c   : > { %p867_p2 = pnand %p866_p3, %p860_p0 }
  0x1e   : > { %870 = shalt.err (!%p867_p2)
}
  0x1f   : > { %s917_s28 = smov 128   ;;  %s918_s29 = smov 8  }
  0x20   : > { %798 = dma.hbm_to_vmem [thread:$0]  (!%p966_p5), %s1058_s1, 2048, %s127_s15, [#allocation3], %s917_s28, %s917_s28, %s918_s29  }
  0x21   : > { %s871_s7 = scalar_lea.hbm %s1059_s2, 2048 }
  0x22   : > { %p872_p6 = scmp.ne.s32.totalorder %s1059_s2, %s871_s7  ;;  %p878_p8 = scmp.lt.u32.totalorder %s871_s7, %s1059_s2 }
  0x24   : > { %p874_p2 = pnand %p872_p6, %p845_p7 }
  0x26   : > { %p875_p3 = pneg %p874_p2 }
  0x28   : > { %p880_p9 = pnand %p878_p8, %p875_p3 }
  0x2a   : > { %883 = shalt.err (!%p880_p9)
}
  0x2b   : > { %s884_s14 = scalar_lea.vmem %s970_s18, 2048  ;;  %p892_p13 = scmp.lt.s32.totalorder %s970_s18, %s970_s18 }
  0x2c   : > { %p885_p10 = scmp.ne.s32.totalorder %s970_s18, %s884_s14  ;;  %p893_p0 = scmp.lt.s32.totalorder %s884_s14, %s884_s14 }
  0x2e   : > { %p887_p11 = pnand %p885_p10, %p845_p7  ;;  %p894_p1 = por %p893_p0, %p892_p13 }
  0x30   : > { %p888_p12 = pneg %p887_p11 }
  0x32   : > { %p895_p4 = pnand %p894_p1, %p888_p12 }
  0x34   : > { %898 = shalt.err (!%p895_p4)
}
  0x35   : > { %801 = dma.hbm_to_vmem [thread:$0]  (!%p966_p5), %s1059_s2, 2048, %s970_s18, [#allocation5], %s917_s28, %s917_s28, %s918_s29  }
  0x36   : > { %p1065_p6 = scmp.ne.s32.totalorder %s1063_s16, 0 }
  0x37   : > { %p1066_p2 = scmp.eq.s32.totalorder (!%p1065_p6), %s953_s13, 0 }
  0x38   : > { %164 = sbr.rel (%p1065_p6) target bundleno = 952 (0x3b8), region = 32 }
  0x3f   : > { %904 = dma.done.wait (%p1066_p2), [#allocation3], 2048   ;;  %p1067_p7 = pmov %p1066_p2 }
  0x40   : > { %p1068_p3 = pmov %p1066_p2 }
  0x41   : > { %906 = vsyncadd (%p1067_p7), [#allocation3], 4294965248 }
  0x42   : > { %908 = dma.done.wait (%p1068_p3), [#allocation5], 2048   ;;  %p1069_p8 = pmov %p1066_p2 }
  0x43   : > { %s598_s19 = sshll.u32 %s953_s13, 1  ;;  %v919_v0 = vmov 0   ;;  %v275_v3 = vld [vmem:[#allocation2] sm:$0xff]  ;;  %v276_v4 = vld [vmem:[#allocation2 + $0x8] sm:$0xff]  ;;  %v277_v9 = vld [vmem:[#allocation2 + $0x10] sm:$0xff]  ;;  %v920_v15 = vmov 1   ;;  %v205_v55 = vlaneseq }
  0x44   : > { %910 = vsyncadd (%p1069_p8), [#allocation5], 4294965248  ;;  %828 = vset.pattern.permute.xlu1 %v919_v0  ;;  %826 = vset.pattern.permute.xlu0 %v919_v0  ;;  %p192_p5 = scmp.lt.s32.totalorder %s598_s19, 3  ;;  %v291_v5 = vld [vmem:[#allocation4] sm:$0xff]  ;;  %v292_v6 = vld [vmem:[#allocation4 + $0x8] sm:$0xff]  ;;  %v721_v7 = vpack.c.bf16 %v276_v4, %v275_v3  ;;  %v921_v22 = vmov 2  }
  0x45   : > { %v753_v8 = vpack.c.bf16 %v292_v6, %v291_v5  ;;  %v278_v10 = vld [vmem:[#allocation2 + $0x18] sm:$0xff]  ;;  %v293_v11 = vld [vmem:[#allocation4 + $0x10] sm:$0xff]  ;;  %v279_v16 = vld [vmem:[#allocation2 + $0x20] sm:$0xff]  ;;  %v922_v30 = vmov 3   ;;  %v923_v31 = vmov 4   ;;  %v206_v58 = vand.u32 127, %v205_v55 }
  0x46   : > { %s1071_s19 = smov (!%p192_p5, %s598_s19), 3  ;;  %v294_v12 = vld [vmem:[#allocation4 + $0x18] sm:$0xff]  ;;  %722 = vmatprep.subr.bf16.mxu0 %v721_v7  ;;  %v725_v13 = vpack.c.bf16 %v278_v10, %v277_v9  ;;  %v280_v17 = vld [vmem:[#allocation2 + $0x28] sm:$0xff]  ;;  %v295_v18 = vld [vmem:[#allocation4 + $0x20] sm:$0xff]  ;;  %v924_v61 = vmov 0.0   ;;  %s926_s22 = smov 123  }
  0x47   : > { %s599_s16 = sshll.u32 %s1071_s19, 3  ;;  %754 = vmatprep.subr.bf16.mxu1 %v753_v8  ;;  %v757_v14 = vpack.c.bf16 %v294_v12, %v293_v11  ;;  %v296_v19 = vld [vmem:[#allocation4 + $0x28] sm:$0xff]  ;;  %724 = vmatpush3.bf16.msra.mxu0 %v721_v7  ;;  %v729_v20 = vpack.c.bf16 %v280_v17, %v279_v16  ;;  %v281_v23 = vld [vmem:[#allocation2 + $0x30] sm:$0xff]  ;;  %v282_v24 = vld [vmem:[#allocation2 + $0x38] sm:$0xff]  ;;  %vm497_vm10 = vcmask 7168   ;;  %p197_p9 = scmp.lt.s32.totalorder %s953_s13, 1 }
  0x48   : > { %s195_s21 = scalar_lea.vmem %s1057_s0, %s599_s16  ;;  %756 = vmatpush3.bf16.msra.mxu1 %v753_v8  ;;  %726 = vmatprep.subr.bf16.mxu0 %v725_v13  ;;  %v761_v21 = vpack.c.bf16 %v296_v19, %v295_v18  ;;  %v297_v25 = vld [vmem:[#allocation4 + $0x30] sm:$0xff]  ;;  %v298_v26 = vld [vmem:[#allocation4 + $0x38] sm:$0xff]  ;;  %v733_v27 = vpack.c.bf16 %v282_v24, %v281_v23  ;;  %v283_v29 = vld [vmem:[#allocation2 + $0x40] sm:$0xff] }
  0x49   : > { %v1033_v1 = vld [vmem:[%s195_s21 + $0x8] sm:$0xff]  ;;  %v1035_v2 = vld [vmem:[%s195_s21] sm:$0xff]  ;;  %758 = vmatprep.subr.bf16.mxu1 %v757_v14  ;;  %v765_v28 = vpack.c.bf16 %v298_v26, %v297_v25  ;;  %v285_v37 = vld [vmem:[#allocation2 + $0x50] sm:$0xff]  ;;  %s1073_s13 = smov (!%p197_p9, %s953_s13), 1 }
  0x4a   : > { %211 = vperm.xlu1 %828, %v1033_v1   ;;  %208 = vperm.xlu0 %826, %v1035_v2   ;;  %v284_v32 = vld [vmem:[#allocation2 + $0x48] sm:$0xff]  ;;  %v299_v33 = vld [vmem:[#allocation4 + $0x40] sm:$0xff]  ;;  %v286_v38 = vld [vmem:[#allocation2 + $0x58] sm:$0xff]  ;;  %s600_s23 = sshll.u32 %s1073_s13, 3 }
  0x4b   : > { %728 = vmatpush3.bf16.msra.mxu0 %v725_v13  ;;  %v300_v34 = vld [vmem:[#allocation4 + $0x48] sm:$0xff]  ;;  %v737_v35 = vpack.c.bf16 %v284_v32, %v283_v29  ;;  %v301_v39 = vld [vmem:[#allocation4 + $0x50] sm:$0xff]  ;;  %v302_v40 = vld [vmem:[#allocation4 + $0x58] sm:$0xff]  ;;  %v741_v41 = vpack.c.bf16 %v286_v38, %v285_v37  ;;  %v925_v13 = vmov 1.0   ;;  %v203_v29 = vcvt.s32.f32 %v1035_v2  ;;  %s200_s28 = scalar_lea.vmem %s1060_s3, %s600_s23 }
  0x4c   : > { %760 = vmatpush3.bf16.msra.mxu1 %v757_v14  ;;  %730 = vmatprep.subr.bf16.mxu0 %v729_v20  ;;  %v769_v36 = vpack.c.bf16 %v300_v34, %v299_v33  ;;  %v773_v42 = vpack.c.bf16 %v302_v40, %v301_v39  ;;  %v287_v43 = vld [vmem:[#allocation2 + $0x60] sm:$0xff]  ;;  %v288_v44 = vld [vmem:[#allocation2 + $0x68] sm:$0xff]  ;;  %v289_v49 = vld [vmem:[#allocation2 + $0x70] sm:$0xff] }
  0x4d   : > { %762 = vmatprep.subr.bf16.mxu1 %v761_v21  ;;  %v303_v45 = vld [vmem:[#allocation4 + $0x60] sm:$0xff]  ;;  %v304_v46 = vld [vmem:[#allocation4 + $0x68] sm:$0xff]  ;;  %v745_v47 = vpack.c.bf16 %v288_v44, %v287_v43  ;;  %v290_v50 = vld [vmem:[#allocation2 + $0x78] sm:$0xff] }
  0x4e   : > { %829 = vset.pattern.permute.xlu1 %v920_v15  ;;  %827 = vset.pattern.permute.xlu0 %v920_v15  ;;  %v777_v48 = vpack.c.bf16 %v304_v46, %v303_v45  ;;  %v305_v51 = vld [vmem:[#allocation4 + $0x70] sm:$0xff]  ;;  %v306_v52 = vld [vmem:[#allocation4 + $0x78] sm:$0xff]  ;;  %v749_v53 = vpack.c.bf16 %v290_v50, %v289_v49  ;;  %v485_v50 = vand.u32 2147483647, %v203_v29 }
  0x4f   : > { %225 = vperm.xlu1 %829, %v1033_v1   ;;  %222 = vperm.xlu0 %827, %v1035_v2   ;;  %v781_v54 = vpack.c.bf16 %v306_v52, %v305_v51 }
  0x50   : > { %732 = vmatpush3.bf16.msra.mxu0 %v729_v20  ;;  %764 = vmatpush3.bf16.msra.mxu1 %v761_v21 }
  0x51   : > { %734 = vmatprep.subr.bf16.mxu0 %v733_v27  ;;  %766 = vmatprep.subr.bf16.mxu1 %v765_v28 }
  0x53   : > { %830 = vset.pattern.permute.xlu1 %v921_v22  ;;  %831 = vset.pattern.permute.xlu0 %v921_v22 }
  0x54   : > { %236 = vperm.xlu1 %830, %v1035_v2   ;;  %239 = vperm.xlu0 %831, %v1033_v1  }
  0x55   : > { %736 = vmatpush3.bf16.msra.mxu0 %v733_v27  ;;  %768 = vmatpush3.bf16.msra.mxu1 %v765_v28  ;;  %v204_v27 = vcvt.s32.f32 %v1033_v1 }
  0x56   : > { %738 = vmatprep.subr.bf16.mxu0 %v737_v35  ;;  %770 = vmatprep.subr.bf16.mxu1 %v769_v36 }
  0x58   : > { %832 = vset.pattern.permute.xlu1 %v922_v30  ;;  %833 = vset.pattern.permute.xlu0 %v923_v31 }
  0x59   : > { %250 = vperm.xlu1 %832, %v1035_v2   ;;  %264 = vperm.xlu0 %833, %v1035_v2  }
  0x5a   : > { %740 = vmatpush3.bf16.msra.mxu0 %v737_v35  ;;  %772 = vmatpush3.bf16.msra.mxu1 %v769_v36 }
  0x5b   : > { %742 = vmatprep.subr.bf16.mxu0 %v741_v41  ;;  %774 = vmatprep.subr.bf16.mxu1 %v773_v42 }
  0x5d   : > { %253 = vperm.xlu1 %832, %v1033_v1  }
  0x5e   : > { %744 = vmatpush3.bf16.msra.mxu0 %v741_v41  ;;  %776 = vmatpush3.bf16.msra.mxu1 %v773_v42 }
  0x5f   : > { %746 = vmatprep.subr.bf16.mxu0 %v745_v47  ;;  %778 = vmatprep.subr.bf16.mxu1 %v777_v48 }
  0x61   : > { %834 = vset.pattern.permute.xlu1 %v923_v31 }
  0x62   : > { %267 = vperm.xlu1 %834, %v1033_v1   ;;  %748 = vmatpush3.bf16.msra.mxu0 %v745_v47  ;;  %v486_v47 = vand.u32 2147483647, %v204_v27 }
  0x63   : > { %780 = vmatpush3.bf16.msra.mxu1 %v777_v48  ;;  %750 = vmatprep.subr.bf16.mxu0 %v749_v53 }
  0x64   : > { %782 = vmatprep.subr.bf16.mxu1 %v781_v54 }
  0x66   : > { %752 = vmatpush3.bf16.msra.mxu0 %v749_v53 }
  0x67   : > { %784 = vmatpush3.bf16.msra.mxu1 %v781_v54 }
  0xc9   : > { %v212_v56 = vpop.permute.xlu1 %211  ;;  %v209_v57 = vpop.permute.xlu0 %208 }
  0xca   : > { %vm213_vm0 = vcmp.eq.s32.totalorder %v206_v58, %v209_v57  ;;  %vm214_vm4 = vcmp.eq.s32.totalorder %v206_v58, %v212_v56 }
  0xcb   : > { %v601_v62 = vsel %vm213_vm0, 1.0, %v924_v61  ;;  %v602_v10 = vsel %vm214_vm4, 1.0, %v924_v61 }
  0xce   : > { %v226_v59 = vpop.permute.xlu1 %225  ;;  %v223_v60 = vpop.permute.xlu0 %222 }
  0xcf   : > { %vm227_vm1 = vcmp.eq.s32.totalorder %v206_v58, %v223_v60  ;;  %vm228_vm3 = vcmp.eq.s32.totalorder %v206_v58, %v226_v59 }
  0xd0   : > { %v603_v63 = vsel %vm227_vm1, 1.0, %v924_v61  ;;  %v604_v6 = vsel %vm228_vm3, 1.0, %v924_v61 }
  0xd1   : > { %v233_v4 = vadd.f32 %v603_v63, %v601_v62  ;;  %v234_v14 = vadd.f32 %v604_v6, %v602_v10 }
  0xd3   : > { %v237_v0 = vpop.permute.xlu1 %236  ;;  %v240_v3 = vpop.permute.xlu0 %239 }
  0xd4   : > { %vm241_vm2 = vcmp.eq.s32.totalorder %v206_v58, %v237_v0  ;;  %vm242_vm5 = vcmp.eq.s32.totalorder %v206_v58, %v240_v3 }
  0xd5   : > { %v605_v5 = vsel %vm241_vm2, 1.0, %v924_v61  ;;  %v606_v11 = vsel %vm242_vm5, 1.0, %v924_v61 }
  0xd6   : > { %v247_v9 = vadd.f32 %v605_v5, %v233_v4  ;;  %v248_v17 = vadd.f32 %v606_v11, %v234_v14 }
  0xd8   : > { %v251_v7 = vpop.permute.xlu1 %250  ;;  %v265_v8 = vpop.permute.xlu0 %264 }
  0xd9   : > { %vm255_vm6 = vcmp.eq.s32.totalorder %v206_v58, %v251_v7  ;;  %vm269_vm7 = vcmp.eq.s32.totalorder %v206_v58, %v265_v8 }
  0xda   : > { %v607_v12 = vsel %vm255_vm6, 1.0, %v924_v61  ;;  %718 = vmatprep.mubr.msk.f32.mxu1 %vm269_vm7, %v925_v13 }
  0xdb   : > { %v261_v15 = vadd.f32 %v607_v12, %v247_v9 }
  0xdc   : > { %v254_v16 = vpop.permute.xlu1 %253 }
  0xdd   : > { %vm256_vm8 = vcmp.eq.s32.totalorder %v206_v58, %v254_v16  ;;  %683 = vmatprep.mubr.f32.mxu0 %v261_v15 }
  0xde   : > { %v608_v18 = vsel %vm256_vm8, 1.0, %v924_v61 }
  0xdf   : > { %v262_v19 = vadd.f32 %v608_v18, %v248_v17 }
  0xe1   : > { %v268_v20 = vpop.permute.xlu1 %267  ;;  %684 = vmatmul.mubr.f32.vlgmr.msra.gmra.mrb[0].mxu0 %v262_v19 }
  0xe2   : > { %vm270_vm9 = vcmp.eq.s32.totalorder %v206_v58, %v268_v20 }
  0xe3   : > { %719 = vmatmul.mubr.msk.f32.vlgmr.msra.gmra.mrb[0].mxu1 %vm270_vm9, %v925_v13 }
 0x1b4   : > { %v685_v21 = vpop.f32.mrb[0].mxu0 }
 0x1b5   : > { %v373_v22 = vpop.f32.mrb[1].mxu0 }
 0x1b6   : > { %v720_v23 = vpop.f32.mrb[0].mxu1 }
 0x1b7   : > { %v458_v24 = vmul.f32 %v720_v23, %v685_v21  ;;  %v448_v25 = vpop.f32.mrb[1].mxu1 }
 0x1b8   : > { %v457_v26 = vmul.f32 %v448_v25, %v373_v22 }
 0x1b9   : > { %461 = vadd.xlane.f32.xlu0 %v458_v24 }
 0x1ba   : > { %459 = vadd.xlane.f32.xlu1 %v457_v26 }
 0x246   : > { %v462_v28 = vpop.xlane.xlu0 %461 }
 0x247   : > { %v464_v30 = vmul.f32 0.25, %v462_v28  ;;  %v460_v31 = vpop.xlane.xlu1 %459 }
 0x248   : > { %v463_v32 = vmul.f32 0.25, %v460_v31 }
 0x249   : > { %v466_v33 = vmul.f32 %v464_v30, %v204_v27 }
 0x24a   : > { %v465_v34 = vmul.f32 %v463_v32, %v203_v29 }
 0x24b   : > { %v470_v35 = vand.u32 2147483647, %v466_v33  ;;  %v468_v45 = vmin.f32 %v466_v33, 0.0 }
 0x24c   : > { %v469_v36 = vand.u32 2147483647, %v465_v34  ;;  %v467_v48 = vmin.f32 %v465_v34, 0.0 }
 0x24d   : > { %v472_v37 = vsub.f32 0.0, %v470_v35 }
 0x24e   : > { %v471_v38 = vsub.f32 0.0, %v469_v36 }
 0x24f   : > { %v475_v39 = vmul.f32 1.442695, %v472_v37 }
 0x250   : > { %v473_v40 = vmul.f32 1.442695, %v471_v38 }
 0x251   : > { %835 = vpow2.f32 %v475_v39 }
 0x252   : > { %837 = vpow2.f32 %v473_v40 }
 0x25b   : > { %v836_v41 = vpop.eup %835 }
 0x25c   : > { %v838_v42 = vpop.eup %837  ;;  %v478_v43 = vadd.f32 1.0, %v836_v41 }
 0x25d   : > { %v477_v1 = vadd.f32 1.0, %v838_v42 }
 0x25e   : > { %839 = vlog2.f32 %v478_v43 }
 0x25f   : > { %841 = vlog2.f32 %v477_v1 }
 0x268   : > { %v840_v2 = vpop.eup %839 }
 0x269   : > { %v842_v44 = vpop.eup %841  ;;  %v482_v46 = vmul.f32 0.6931472, %v840_v2 }
 0x26a   : > { %v480_v49 = vmul.f32 0.6931472, %v842_v44 }
 0x26b   : > { %v484_v51 = vsub.f32 %v468_v45, %v482_v46 }
 0x26c   : > { %v483_v52 = vsub.f32 %v467_v48, %v480_v49 }
 0x26d   : > { %v488_v53 = vmul.f32 %v486_v47, %v484_v51 }
 0x26e   : > { %v487_v54 = vmul.f32 %v485_v50, %v483_v52 }
 0x26f   : > { %493 = vrot.lane.b32.xlu1 %v488_v53, %s926_s22 }
 0x270   : > { %491 = vrot.lane.b32.xlu0 %v487_v54, %s926_s22 }
 0x2e1   : > { %v494_v55 = vpop.permute.xlu1 %493 }
 0x2e2   : > { %v499_v56 = vsel %vm497_vm10, %v494_v55, 0.0  ;;  %v492_v57 = vpop.permute.xlu0 %491 }
 0x2e3   : > { %v498_v58 = vsel %vm497_vm10, %v492_v57, 0.0 }
 0x2e4   : > { %v500_v59 = vadd.f32 %v499_v56, %v498_v58 }
 0x2e6   : > { %501 = vadd.xlane.f32.xlu1 %v500_v59 }
 0x373   : > { %v502_v60 = vpop.xlane.xlu1 %501 }
 0x374   : > { %v503_v61 = vrot.slane %v502_v60, 4 }
 0x376   : > { %v504_v62 = vadd.f32 %v503_v61, %v502_v60 }
 0x378   : > { %v505_v63 = vrot.slane %v504_v62, 2 }
 0x37a   : > { %v506_v0 = vadd.f32 %v505_v63, %v504_v62 }
 0x37c   : > { %v507_v3 = vrot.slane %v506_v0, 1 }
 0x37e   : > { %v508_v4 = vadd.f32 %v507_v3, %v506_v0 }
 0x380   : > { %785 = vpush %v508_v4 }
 0x3b1   : > { %s786_s24 = spop %785 }
 0x3b2   : > { %s510_s25 = ssub.f32 0.0, %s786_s24 }
 0x3b4   : > { %s511_s29 = smul.f32 0.0078125, %s510_s25 }
 0x3b6   : > { %v512_v5 = vstv %s511_s29 }
 0x3b7   : > { %513 = vst [vmem:[%s200_s28] sm:$0xff] %v512_v5 }
 0x3b8 PF: > { %s15_s12 = sadd.s32 1, %s913_s12  }
 0x3b9   : > { %p12_p10 = scmp.ge.s32.totalorder %s15_s12, 4  }
 0x3bb   :  { %14 = sbr.rel (!%p12_p10) target bundleno = 2 (0x2), region = 71 }
 0x3c2   :  { %533 = vsyncpa [#allocation3], 1 }
 0x3c3   :  { %535 = vsyncpa [#allocation3 + $0x1], 1 }
 0x3c4   :  { %536 = vsyncpa [#allocation5], 1 }

</bundles_post_ra>
